<compile_context>
chip_gen: v6e
topology: v6e:2x2x1
jax: 0.10.0
libtpu: 0.0.40
codegen_flags: <defaults>
</compile_context>

<pallas_src>
import functools

import jax
import jax.numpy as jnp
from jax import lax
from jax.experimental import pallas as pl
from jax.experimental.pallas import tpu as pltpu

_EPS = 1e-9


def _fused_softmax_logsoftmax(x):
    """One max/exp/sum pipeline shared by softmax and log_softmax."""
    m = jnp.max(x, axis=1, keepdims=True)
    shifted = x - m
    e = jnp.exp(shifted)
    s = jnp.sum(e, axis=1, keepdims=True)
    sm = e * pl.reciprocal(s, approx=True)          # guarded downstream by |1-pred|+eps
    log_sm = shifted - jnp.log(s)
    return sm, log_sm


def _corr_loss_kernel(output_w_ref, output_s_ref, target_ref,
                      part_ref, new_target_ref,
                      *, n_rows, tile_rows, rows_ragged):
    # Load native-dtype tiles (possibly bf16) and promote once.
    ow = output_w_ref[...].astype(jnp.float32)
    os_ = output_s_ref[...].astype(jnp.float32)
    target = target_ref[...].astype(jnp.float32)

    pred_w, log_sm_w = _fused_softmax_logsoftmax(ow)
    pred_s, log_sm_s = _fused_softmax_logsoftmax(os_)

    # ---- supervised (negative-candidate) loss ----
    # -log(a) - log(b) folded into one log; abs matches reference `abs(1-pred)` and guards
    # the approx-reciprocal softmax against pred marginally exceeding 1.
    neg = (target == 0).astype(jnp.float32)
    sup_elem = neg * (-jnp.log((jnp.abs(1.0 - pred_w) + _EPS)
                               * (jnp.abs(1.0 - pred_s) + _EPS)))

    # ---- consistency (KL, batchmean) loss on both views ----
    # kl summed = sum(t*log t - t*log_p); t*log t hoisted and shared (x2), zero where t==0
    # (matches torch.nn.functional.kl_div's handling of zero targets).
    safe_t = jnp.where(target > 0, target, 1.0)
    tlogt = jnp.where(target > 0, target * jnp.log(safe_t), 0.0)
    kl_elem = 2.0 * tlogt - target * (log_sm_w + log_sm_s)

    row_sum = jnp.sum(sup_elem + kl_elem, axis=1, keepdims=True)      # (tb, 1)

    if rows_ragged:
        # Only the (possibly partial) last tile has garbage rows; mask their contribution.
        i = pl.program_id(0)
        row_ids = lax.broadcasted_iota(jnp.int32, row_sum.shape, 0) + i * tile_rows
        row_sum = jnp.where(row_ids < n_rows, row_sum, 0.0)

    tile_sum = jnp.sum(row_sum, axis=0, keepdims=True)                # (1, 1)
    # Per-tile partial loss: lane-dense (8,128) block, no cross-tile dependency, so the
    # batch grid axis can be "parallel" (v7x megacore).
    part_ref[...] = jnp.broadcast_to(tile_sum, part_ref.shape)

    # ---- target re-estimation (update_target=True path) ----
    revisedY = (target > 0).astype(jnp.float32)     # candidate mask (revisedY**2 == revisedY)
    rY = jnp.sqrt(revisedY * pred_s * pred_w)
    denom = jnp.sum(rY, axis=1, keepdims=True) + _EPS
    # Exact division: this feeds the iteratively re-used confidence table.
    new_target_ref[...] = (rY / denom).astype(new_target_ref.dtype)


def corr_loss(output_w, output_s, index, confidence, *, update_target=True):
    """Returns (loss, new_confidence). new_confidence == confidence when update_target=False."""
    B, C = output_w.shape

    # glue: gather the per-example candidate/confidence rows (data-dependent indexing)
    target = confidence[index]

    # ---- adaptive batch tile sized against the per-generation VMEM budget ----
    try:
        vmem_cap = int(pltpu.get_tpu_info().vmem_capacity_bytes)
    except Exception:
        vmem_cap = 64 * 1024 * 1024            # conservative default (v7x per-TC)
    c_pad = max(128, ((C + 127) // 128) * 128)  # lane-padded VMEM footprint per row
    bytes_per_row = 2 * 4 * c_pad * 4           # 2 bufs x (3 in + 1 out) x f32
    budget = min(vmem_cap // 8, 16 * 1024 * 1024)
    tb = max(8, min(1024, budget // bytes_per_row))
    tb = (tb // 8) * 8                          # sublane-aligned
    if tb >= B:
        tb = B                                  # single full-extent tile
    num_tiles = pl.cdiv(B, tb)
    rows_ragged = (B % tb) != 0
    vmem_limit = int(min(vmem_cap // 2, 6 * budget))

    kernel = functools.partial(_corr_loss_kernel,
                               n_rows=B, tile_rows=tb, rows_ragged=rows_ragged)

    blk_in = pl.BlockSpec((tb, C), lambda i: (i, 0))
    part, new_target = pl.pallas_call(
        kernel,
        out_shape=(jax.ShapeDtypeStruct((8 * num_tiles, 128), jnp.float32),
                   jax.ShapeDtypeStruct((B, C), confidence.dtype)),
        grid=(num_tiles,),
        in_specs=[blk_in, blk_in, blk_in],
        out_specs=(pl.BlockSpec((8, 128), lambda i: (i, 0)),
                   pl.BlockSpec((tb, C), lambda i: (i, 0))),
        compiler_params=pltpu.CompilerParams(
            dimension_semantics=("parallel",),   # per-tile partials => no ordering needed
            vmem_limit_bytes=vmem_limit),
    )(output_w, output_s, target)

    # Each (8,128) block is filled with its tile's partial sum; pick one lane per tile.
    loss = jnp.sum(part[0::8, 0]) * (1.0 / float(B))

    if not update_target:
        return loss, confidence

    # glue: scatter the updated targets back (in place when `confidence` is donated).
    new_confidence = confidence.at[index].set(new_target)
    return loss, new_confidence


if __name__ == "__main__":
    key = jax.random.PRNGKey(0)
    B, C, N = 8, 16, 32   # batch, classes, dataset size

    ks = jax.random.split(key, 5)
    output_w = jax.random.normal(ks[0], (B, C), jnp.float32)
    output_s = jax.random.normal(ks[1], (B, C), jnp.float32)

    # partial-label confidence table: candidate mask (>=1 candidate / row), row-normalized
    true_label = jax.random.randint(ks[2], (N,), 0, C)
    cand = (jax.random.uniform(ks[3], (N, C)) < 0.3).astype(jnp.float32)
    cand = jnp.maximum(cand, jax.nn.one_hot(true_label, C, dtype=jnp.float32))
    confidence = cand / jnp.sum(cand, axis=1, keepdims=True)

    index = jax.random.randint(ks[4], (B,), 0, N)

    # Donate the confidence table so the .at[index].set scatter is done in place
    # (avoids copying the whole (N, C) table every step).
    loss_fn = jax.jit(functools.partial(corr_loss, update_target=True),
                      donate_argnums=(3,))
    loss, new_confidence = loss_fn(output_w, output_s, index, confidence)

    jax.block_until_ready((loss, new_confidence))
    assert jnp.isfinite(loss)
    assert bool(jnp.all(jnp.isfinite(new_confidence)))
    print("KERNEL_OK")
</pallas_src>

<mosaic_0001>
module attributes {stable_mosaic.version = 11 : i64} {
  func.func @_corr_loss_kernel(%arg0: i32, %arg1: memref<8x16xf32, #tpu.memory_space<vmem>>, %arg2: memref<8x16xf32, #tpu.memory_space<vmem>>, %arg3: memref<8x16xf32, #tpu.memory_space<vmem>>, %arg4: memref<8x128xf32, #tpu.memory_space<vmem>>, %arg5: memref<8x16xf32, #tpu.memory_space<vmem>>) attributes {dimension_semantics = [#tpu.dimension_semantics<parallel>], iteration_bounds = array<i64: 1>, scalar_prefetch = 0 : i64, scratch_operands = 0 : i64, tpu.core_type = #tpu.core_type<tc>, window_params = [{transform_indices = @transform_0, window_bounds = array<i64: 8, 16>}, {transform_indices = @transform_1, window_bounds = array<i64: 8, 16>}, {transform_indices = @transform_2, window_bounds = array<i64: 8, 16>}, {transform_indices = @transform_3, window_bounds = array<i64: 8, 128>}, {transform_indices = @transform_4, window_bounds = array<i64: 8, 16>}]} {
    %c0 = arith.constant 0 : index
    %c0_0 = arith.constant 0 : index
    %0 = vector.load %arg1[%c0, %c0_0] : memref<8x16xf32, #tpu.memory_space<vmem>>, vector<8x16xf32>
    %c0_1 = arith.constant 0 : index
    %c0_2 = arith.constant 0 : index
    %1 = vector.load %arg2[%c0_1, %c0_2] : memref<8x16xf32, #tpu.memory_space<vmem>>, vector<8x16xf32>
    %c0_3 = arith.constant 0 : index
    %c0_4 = arith.constant 0 : index
    %2 = vector.load %arg3[%c0_3, %c0_4] : memref<8x16xf32, #tpu.memory_space<vmem>>, vector<8x16xf32>
    %cst = arith.constant dense<0xFF800000> : vector<8xf32>
    %3 = vector.multi_reduction <maximumf>, %0, %cst [1] : vector<8x16xf32> to vector<8xf32>
    %4 = vector.shape_cast %3 : vector<8xf32> to vector<8x1xf32>
    %5 = vector.broadcast %4 : vector<8x1xf32> to vector<8x16xf32>
    %6 = arith.subf %0, %5 : vector<8x16xf32>
    %7 = math.exp %6 : vector<8x16xf32>
    %cst_5 = arith.constant dense<0.000000e+00> : vector<8xf32>
    %8 = vector.multi_reduction <add>, %7, %cst_5 [1] : vector<8x16xf32> to vector<8xf32>
    %9 = vector.shape_cast %8 : vector<8xf32> to vector<8x1xf32>
    %10 = tpu.reciprocal %9 {approx = true} : vector<8x1xf32> -> vector<8x1xf32>
    %11 = vector.broadcast %10 : vector<8x1xf32> to vector<8x16xf32>
    %12 = arith.mulf %7, %11 : vector<8x16xf32>
    %13 = math.log %9 : vector<8x1xf32>
    %14 = vector.broadcast %13 : vector<8x1xf32> to vector<8x16xf32>
    %15 = arith.subf %6, %14 : vector<8x16xf32>
    %cst_6 = arith.constant dense<0xFF800000> : vector<8xf32>
    %16 = vector.multi_reduction <maximumf>, %1, %cst_6 [1] : vector<8x16xf32> to vector<8xf32>
    %17 = vector.shape_cast %16 : vector<8xf32> to vector<8x1xf32>
    %18 = vector.broadcast %17 : vector<8x1xf32> to vector<8x16xf32>
    %19 = arith.subf %1, %18 : vector<8x16xf32>
    %20 = math.exp %19 : vector<8x16xf32>
    %cst_7 = arith.constant dense<0.000000e+00> : vector<8xf32>
    %21 = vector.multi_reduction <add>, %20, %cst_7 [1] : vector<8x16xf32> to vector<8xf32>
    %22 = vector.shape_cast %21 : vector<8xf32> to vector<8x1xf32>
    %23 = tpu.reciprocal %22 {approx = true} : vector<8x1xf32> -> vector<8x1xf32>
    %24 = vector.broadcast %23 : vector<8x1xf32> to vector<8x16xf32>
    %25 = arith.mulf %20, %24 : vector<8x16xf32>
    %26 = math.log %22 : vector<8x1xf32>
    %27 = vector.broadcast %26 : vector<8x1xf32> to vector<8x16xf32>
    %28 = arith.subf %19, %27 : vector<8x16xf32>
    %cst_8 = arith.constant 0.000000e+00 : f32
    %29 = vector.broadcast %cst_8 : f32 to vector<8x16xf32>
    %30 = arith.cmpf oeq, %2, %29 : vector<8x16xf32>
    %31 = arith.extui %30 : vector<8x16xi1> to vector<8x16xi32>
    %32 = arith.sitofp %31 : vector<8x16xi32> to vector<8x16xf32>
    %cst_9 = arith.constant 1.000000e+00 : f32
    %33 = vector.broadcast %cst_9 : f32 to vector<8x16xf32>
    %34 = arith.subf %33, %12 : vector<8x16xf32>
    %35 = math.absf %34 : vector<8x16xf32>
    %cst_10 = arith.constant 9.99999971E-10 : f32
    %36 = vector.broadcast %cst_10 : f32 to vector<8x16xf32>
    %37 = arith.addf %35, %36 : vector<8x16xf32>
    %cst_11 = arith.constant 1.000000e+00 : f32
    %38 = vector.broadcast %cst_11 : f32 to vector<8x16xf32>
    %39 = arith.subf %38, %25 : vector<8x16xf32>
    %40 = math.absf %39 : vector<8x16xf32>
    %cst_12 = arith.constant 9.99999971E-10 : f32
    %41 = vector.broadcast %cst_12 : f32 to vector<8x16xf32>
    %42 = arith.addf %40, %41 : vector<8x16xf32>
    %43 = arith.mulf %37, %42 : vector<8x16xf32>
    %44 = math.log %43 : vector<8x16xf32>
    %cst_13 = arith.constant 0.000000e+00 : f32
    %45 = vector.broadcast %cst_13 : f32 to vector<8x16xf32>
    %46 = arith.subf %45, %44 : vector<8x16xf32>
    %47 = arith.mulf %32, %46 : vector<8x16xf32>
    %cst_14 = arith.constant 0.000000e+00 : f32
    %48 = vector.broadcast %cst_14 : f32 to vector<8x16xf32>
    %49 = arith.cmpf ogt, %2, %48 : vector<8x16xf32>
    %cst_15 = arith.constant 1.000000e+00 : f32
    %50 = vector.broadcast %cst_15 : f32 to vector<8x16xf32>
    %51 = arith.select %49, %2, %50 : vector<8x16xi1>, vector<8x16xf32>
    %cst_16 = arith.constant 0.000000e+00 : f32
    %52 = vector.broadcast %cst_16 : f32 to vector<8x16xf32>
    %53 = arith.cmpf ogt, %2, %52 : vector<8x16xf32>
    %54 = math.log %51 : vector<8x16xf32>
    %55 = arith.mulf %2, %54 : vector<8x16xf32>
    %cst_17 = arith.constant 0.000000e+00 : f32
    %56 = vector.broadcast %cst_17 : f32 to vector<8x16xf32>
    %57 = arith.select %53, %55, %56 : vector<8x16xi1>, vector<8x16xf32>
    %cst_18 = arith.constant 2.000000e+00 : f32
    %58 = vector.broadcast %cst_18 : f32 to vector<8x16xf32>
    %59 = arith.mulf %58, %57 : vector<8x16xf32>
    %60 = arith.addf %15, %28 : vector<8x16xf32>
    %61 = arith.mulf %2, %60 : vector<8x16xf32>
    %62 = arith.subf %59, %61 : vector<8x16xf32>
    %63 = arith.addf %47, %62 : vector<8x16xf32>
    %cst_19 = arith.constant dense<0.000000e+00> : vector<8xf32>
    %64 = vector.multi_reduction <add>, %63, %cst_19 [1] : vector<8x16xf32> to vector<8xf32>
    %65 = vector.shape_cast %64 : vector<8xf32> to vector<8x1xf32>
    %cst_20 = arith.constant dense<0.000000e+00> : vector<1xf32>
    %66 = vector.multi_reduction <add>, %65, %cst_20 [0] : vector<8x1xf32> to vector<1xf32>
    %67 = vector.shape_cast %66 : vector<1xf32> to vector<1x1xf32>
    %68 = vector.shape_cast %67 : vector<1x1xf32> to vector<1x1xf32>
    %69 = vector.broadcast %68 : vector<1x1xf32> to vector<8x128xf32>
    %c0_21 = arith.constant 0 : index
    %c0_22 = arith.constant 0 : index
    %70 = vector.load %arg4[%c0_21, %c0_22] : memref<8x128xf32, #tpu.memory_space<vmem>>, vector<8x128xf32>
    tpu.vector_store %arg4[%c0_21, %c0_22], %69 {strides = array<i32>} : memref<8x128xf32, #tpu.memory_space<vmem>>, vector<8x128xf32>,
    %cst_23 = arith.constant 0.000000e+00 : f32
    %71 = vector.broadcast %cst_23 : f32 to vector<8x16xf32>
    %72 = arith.cmpf ogt, %2, %71 : vector<8x16xf32>
    %73 = arith.extui %72 : vector<8x16xi1> to vector<8x16xi32>
    %74 = arith.sitofp %73 : vector<8x16xi32> to vector<8x16xf32>
    %75 = arith.mulf %74, %25 : vector<8x16xf32>
    %76 = arith.mulf %75, %12 : vector<8x16xf32>
    %77 = math.sqrt %76 : vector<8x16xf32>
    %cst_24 = arith.constant dense<0.000000e+00> : vector<8xf32>
    %78 = vector.multi_reduction <add>, %77, %cst_24 [1] : vector<8x16xf32> to vector<8xf32>
    %79 = vector.shape_cast %78 : vector<8xf32> to vector<8x1xf32>
    %cst_25 = arith.constant 9.99999971E-10 : f32
    %80 = vector.broadcast %cst_25 : f32 to vector<8x1xf32>
    %81 = arith.addf %79, %80 : vector<8x1xf32>
    %82 = vector.broadcast %81 : vector<8x1xf32> to vector<8x16xf32>
    %83 = arith.divf %77, %82 : vector<8x16xf32>
    %c0_26 = arith.constant 0 : index
    %c0_27 = arith.constant 0 : index
    %84 = vector.load %arg5[%c0_26, %c0_27] : memref<8x16xf32, #tpu.memory_space<vmem>>, vector<8x16xf32>
    tpu.vector_store %arg5[%c0_26, %c0_27], %83 {strides = array<i32>} : memref<8x16xf32, #tpu.memory_space<vmem>>, vector<8x16xf32>,
    return
  }
  func.func @transform_0(%arg0: i32) -> (i32, i32) {
    %c0_i32 = arith.constant 0 : i32
    %c0_i32_0 = arith.constant 0 : i32
    return %arg0, %c0_i32 : i32, i32
  }
  func.func @transform_1(%arg0: i32) -> (i32, i32) {
    %c0_i32 = arith.constant 0 : i32
    %c0_i32_0 = arith.constant 0 : i32
    return %arg0, %c0_i32 : i32, i32
  }
  func.func @transform_2(%arg0: i32) -> (i32, i32) {
    %c0_i32 = arith.constant 0 : i32
    %c0_i32_0 = arith.constant 0 : i32
    return %arg0, %c0_i32 : i32, i32
  }
  func.func @transform_3(%arg0: i32) -> (i32, i32) {
    %c0_i32 = arith.constant 0 : i32
    %c0_i32_0 = arith.constant 0 : i32
    return %arg0, %c0_i32 : i32, i32
  }
  func.func @transform_4(%arg0: i32) -> (i32, i32) {
    %c0_i32 = arith.constant 0 : i32
    %c0_i32_0 = arith.constant 0 : i32
    return %arg0, %c0_i32 : i32, i32
  }
}

</mosaic_0001>

<bundles_post_ra>
// kernel: corr_loss.1
= control target key start
LH: loop header
LB: loop body
LE: loop exit
PB: predicated region body
PF: predicated region fallthrough
CT: control target
= control target key end

     0   :  { %vm19_vm0 = vcmask 130048   ;;  %v132_v21 = vmov 0.0   ;;  %s183_s0 = inlined_call_operand.vmem [shape: f32[8,16], index: 0, kind: input, shape index: {}]   ;;  %s184_s1 = inlined_call_operand.vmem [shape: f32[8,16], index: 1, kind: input, shape index: {}]   ;;  %s185_s2 = inlined_call_operand.vmem [shape: f32[8,16], index: 2, kind: input, shape index: {}]   ;;  %s186_s4 = inlined_call_operand.vmem [shape: f32[8,16], index: 4, kind: output, shape index: {1}]   ;;  %s187_s3 = inlined_call_operand.vmem [shape: f32[8,128], index: 3, kind: output, shape index: {0}]  }
   0x1   :  { %v16_v0 = vld [vmem:[%s183_s0] sm:$0xff] }
   0x2   :  { %v17_v1 = vld [vmem:[%s184_s1] sm:$0xff]  ;;  %v20_v2 = vsel %vm19_vm0, %v16_v0, -inf }
   0x3   :  { %21 = vmax.xlane.f32.xlu0 %v20_v2  ;;  %v34_v3 = vsel %vm19_vm0, %v17_v1, -inf  ;;  %v18_v16 = vld [vmem:[%s185_s2] sm:$0xff] }
   0x4   :  { %vm62_vm1 = vcmp.gt.f32.partialorder %v18_v16, 0.0  ;;  %vm48_vm4 = vcmp.eq.f32.partialorder %v18_v16, 0.0 }
   0x5   :  { %v63_v18 = vsel %vm62_vm1, %v18_v16, 1.0  ;;  %v110_v22 = vsel %vm62_vm1, 1.0, %v132_v21  ;;  %v109_v54 = vsel %vm48_vm4, 1.0, %v132_v21 }
   0x7   :  { %35 = vmax.xlane.f32.xlu0 %v34_v3 }
  0x8c   :  { %v22_v4 = vpop.xlane.xlu0 %21 }
  0x8d   :  { %v23_v5 = vsub.f32 %v16_v0, %v22_v4 }
  0x8f   :  { %v24_v6 = vmul.f32 1.442695, %v23_v5 }
  0x90   :  { %v36_v7 = vpop.xlane.xlu0 %35 }
  0x91   :  { %112 = vpow2.f32 %v24_v6  ;;  %v37_v8 = vsub.f32 %v17_v1, %v36_v7 }
  0x93   :  { %v38_v9 = vmul.f32 1.442695, %v37_v8 }
  0x95   :  { %114 = vpow2.f32 %v38_v9 }
  0x9e   :  { %v113_v10 = vpop.eup %112 }
  0x9f   :  { %v26_v11 = vsel %vm19_vm0, %v113_v10, 0.0 }
  0xa0   :  { %27 = vadd.xlane.f32.xlu1 %v26_v11 }
  0xa2   :  { %v115_v12 = vpop.eup %114 }
  0xa3   :  { %v40_v13 = vsel %vm19_vm0, %v115_v12, 0.0 }
  0xa4   :  { %41 = vadd.xlane.f32.xlu1 %v40_v13 }
 0x129   :  { %v28_v14 = vpop.xlane.xlu1 %27 }
 0x12a   :  { %116 = vrcp.f32 %v28_v14 }
 0x12d   :  { %v42_v15 = vpop.xlane.xlu1 %41 }
 0x12e   :  { %118 = vrcp.f32 %v42_v15 }
 0x12f   :  { %120 = vlog2.f32 %v42_v15 }
 0x130   :  { %122 = vlog2.f32 %v63_v18 }
 0x131   :  { %124 = vlog2.f32 %v28_v14 }
 0x137   :  { %v117_v17 = vpop.eup %116 }
 0x138   :  { %v30_v19 = vmul.f32 %v117_v17, %v113_v10 }
 0x13a   :  { %v51_v23 = vsub.f32 1.0, %v30_v19 }
 0x13b   :  { %v119_v20 = vpop.eup %118 }
 0x13c   :  { %v44_v24 = vmul.f32 %v119_v20, %v115_v12  ;;  %v52_v27 = vand.u32 2147483647, %v51_v23  ;;  %v121_v33 = vpop.eup %120 }
 0x13d   :  { %v123_v34 = vpop.eup %122  ;;  %v46_v36 = vmul.f32 0.6931472, %v121_v33 }
 0x13e   :  { %v85_v25 = vmul.f32 %v110_v22, %v44_v24  ;;  %v54_v26 = vsub.f32 1.0, %v44_v24  ;;  %v53_v30 = vadd.f32 1e-09, %v52_v27  ;;  %v125_v35 = vpop.eup %124  ;;  %v65_v37 = vmul.f32 0.6931472, %v123_v34 }
 0x13f   :  { %v32_v38 = vmul.f32 0.6931472, %v125_v35  ;;  %v47_v39 = vsub.f32 %v37_v8, %v46_v36 }
 0x140   :  { %v86_v28 = vmul.f32 %v85_v25, %v30_v19  ;;  %v55_v29 = vand.u32 2147483647, %v54_v26  ;;  %v66_v40 = vmul.f32 %v65_v37, %v18_v16 }
 0x141   :  { %v33_v42 = vsub.f32 %v23_v5, %v32_v38 }
 0x142   :  { %126 = vrsqrt.f32 %v86_v28  ;;  %v56_v31 = vadd.f32 1e-09, %v55_v29  ;;  %vm89_vm2 = vcmp.eq.f32.partialorder %v86_v28, inf  ;;  %v92_v44 = vand.u32 2147483648, %v86_v28 }
 0x143   :  { %v69_v45 = vadd.f32 %v47_v39, %v33_v42  ;;  %vm91_vm3 = vcmp.eq.f32.partialorder %v86_v28, 0.0  ;;  %v67_v47 = vsel %vm62_vm1, %v66_v40, 0.0 }
 0x144   :  { %v57_v32 = vmul.f32 %v56_v31, %v53_v30  ;;  %v68_v52 = vmul.f32 2.0, %v67_v47 }
 0x145   :  { %v70_v53 = vmul.f32 %v69_v45, %v18_v16 }
 0x146   :  { %128 = vlog2.f32 %v57_v32 }
 0x147   :  { %v71_v57 = vsub.f32 %v68_v52, %v70_v53 }
 0x14f   :  { %v127_v41 = vpop.eup %126 }
 0x150   :  { %v88_v43 = vmul.f32 %v127_v41, %v86_v28 }
 0x152   :  { %v90_v46 = vsel %vm89_vm2, %v86_v28, %v88_v43 }
 0x153   :  { %v93_v48 = vsel %vm91_vm3, %v92_v44, %v90_v46  ;;  %v129_v49 = vpop.eup %128 }
 0x154   :  { %v94_v50 = vsel %vm19_vm0, %v93_v48, 0.0  ;;  %v59_v51 = vmul.f32 0.6931472, %v129_v49 }
 0x155   :  { %95 = vadd.xlane.f32.xlu0 %v94_v50 }
 0x156   :  { %v60_v55 = vsub.f32 0.0, %v59_v51 }
 0x158   :  { %v61_v56 = vmul.f32 %v109_v54, %v60_v55 }
 0x15a   :  { %v72_v58 = vadd.f32 %v71_v57, %v61_v56 }
 0x15c   :  { %v73_v59 = vsel %vm19_vm0, %v72_v58, 0.0 }
 0x15d   :  { %74 = vadd.xlane.f32.xlu1 %v73_v59 }
 0x1de   :  { %v96_v60 = vpop.xlane.xlu0 %95 }
 0x1df   :  { %v97_v61 = vadd.f32 1e-09, %v96_v60 }
 0x1e1   :  { %130 = vrcp.f32 %v97_v61 }
 0x1e6   :  { %v75_v62 = vpop.xlane.xlu1 %74 }
 0x1e7   :  { %v76_v63 = vrot.slane %v75_v62, 4 }
 0x1e9   :  { %v77_v0 = vadd.f32 %v76_v63, %v75_v62 }
 0x1eb   :  { %v78_v1 = vrot.slane %v77_v0, 2 }
 0x1ed   :  { %v79_v3 = vadd.f32 %v78_v1, %v77_v0 }
 0x1ee   :  { %v131_v2 = vpop.eup %130 }
 0x1ef   :  { %v99_v4 = vmul.f32 %v131_v2, %v93_v48  ;;  %v80_v5 = vrot.slane %v79_v3, 1 }
 0x1f1   :  { %100 = vst.msk [vmem:[%s186_s4] sm:$0xff] %vm19_vm0, %v99_v4  ;;  %v81_v6 = vadd.f32 %v80_v5, %v79_v3 }
 0x1f3   :  { %82 = vst [vmem:[%s187_s3] sm:$0xff] %v81_v6 }

</bundles_post_ra>
